<compile_context>
chip_gen: v7x
topology: tpu7x:2x2x1
jax: 0.10.0
libtpu: 0.0.40
codegen_flags: <defaults>
</compile_context>

<pallas_src>
import jax
import jax.numpy as jnp
from jax.experimental import pallas as pl
from jax.experimental.pallas import tpu as pltpu


_ALIGN = 16  # batch-tile sublane alignment safe for both f32 (8) and bf16 (16) blocks


def _round_up(x, m):
    return ((x + m - 1) // m) * m


def semantic_attention_kernel(q_ref, k_ref, v_ref, wq_ref, wu_ref, b_ref, ww_ref,
                              attn_ref, weights_ref, energies_ref):
    TB = q_ref.shape[0]
    S = k_ref.shape[0] // TB
    Bn = wu_ref.shape[-1]
    V = v_ref.shape[-1]

    q = q_ref[...]          # [TB, Q]     (streaming dtype, bf16 by default)
    keys2d = k_ref[...]     # [TB*S, K]   (streaming dtype)
    vals2d = v_ref[...]     # [TB*S, V]   (streaming dtype)

    # Wh + b hoisted into a single [TB, Bn] term (one MXU matmul, f32 accumulate).
    whb = jnp.dot(q, wq_ref[...], preferred_element_type=jnp.float32) + b_ref[...]

    # Uv: one tall MXU slab straight off the 2-D [TB*S, K] tile (no input
    # reshape). Output is f32, so the reshape below is a free re-view when
    # S == 8 (the f32 sublane count); other S stay correct (Mosaic relayouts).
    uv = jnp.dot(keys2d, wu_ref[...], preferred_element_type=jnp.float32)
    uv = uv.reshape(TB, S, Bn)

    # EUP tanh in f32 (v5e has no bf16 VPU/EUP).
    t = jnp.tanh(whb[:, None, :] + uv)            # [TB, S, Bn]
    # TODO(synk): Bn=32 keeps these vregs lane-sparse (32/128 lanes). If a
    # bundle dump shows EUP as the binding slot, compute uv transposed
    # ([Bn, TB*S] lane-dense) so tanh and the scorer run on full vregs.

    # Scorer as a lane reduction against the broadcast ww row (XLU slot; the
    # MXU stays free for the projections).
    e = jnp.sum(t * ww_ref[...], axis=-1)         # [TB, S]

    # TODO(synk): optional boolean `masks` path (energies[masks] = -inf) not wired in.

    # Softmax over the keys axis S (lane axis here -> cheap lane reduce).
    m = jnp.max(e, axis=-1, keepdims=True)
    ex = jnp.exp(e - m)
    w = ex / jnp.sum(ex, axis=-1, keepdims=True)  # [TB, S]

    # NOTE: lane-SPARSE stores (S=8 / V=32 of 128 lanes) — small share of HBM
    # traffic, kept in the natural layout.
    # TODO(synk): emit batch-on-lanes blocks if these stores ever matter.
    energies_ref[...] = e
    weights_ref[...] = w

    # Weighted sum of values over S: VPU multiply + one cross-sublane (XLU)
    # reduce — NOT a batched MXU contraction. The f32 cast keeps the reshape a
    # free re-view and the accumulation in f32.
    vals = vals2d.astype(jnp.float32).reshape(TB, S, V)
    attn_ref[...] = jnp.sum(vals * w[:, :, None], axis=1)   # [TB, V]


def _vmem_capacity_bytes():
    try:
        info = pltpu.get_tpu_info()
        cap = int(getattr(info, "vmem_capacity_bytes", 0))
        if cap > 0:
            return cap
    except Exception:
        pass
    return 64 << 20   # smallest per-core physical VMEM across v5e/v6e/v7x


def _choose_block_b(batch, seq, stream_itemsize, vmem_cap):
    """Padding-aware batch-tile pick: largest tile inside a conservative VMEM
    budget (streamed refs double-buffered, f32 intermediates, 128-lane padding
    of the narrow feature dims), with >= 2 grid steps when the batch allows
    (keeps both v7x TensorCores busy)."""
    lanes = 128
    per_elem = (2 * (2 * seq * lanes * stream_itemsize   # keys + values tiles (x2 buffers)
                     + lanes * stream_itemsize           # query row
                     + 3 * lanes * 4)                    # attn/weights/energies rows (f32)
                + 4 * seq * lanes * 4)                   # f32 intermediates (uv, t, vals, slack)
    budget = min(vmem_cap // 5, 20 << 20)
    tb_cap = max(_ALIGN, min(4096, budget // per_elem))
    b_aligned = _round_up(batch, _ALIGN)
    n_steps = max(1, -(-b_aligned // tb_cap))
    if b_aligned >= 2 * _ALIGN:
        n_steps = max(2, n_steps)            # >=2 grid steps -> both v7x TCs get work
    return _round_up(-(-b_aligned // n_steps), _ALIGN)


def semantic_attention(query, keys, values, wq, wu, b, ww, *,
                       stream_dtype=jnp.bfloat16, block_b=None):
    """Pallas forward of SemanticAttention.

    query [B, Q], keys [B, S, K], values [B, S, V]; wq [Q, Bn] / wu [K, Bn] are
    the Linear weights pre-transposed (W.weight.T / U.weight.T); b [Bn]; ww [Bn].
    Returns (attn [B, V] f32, weights [B, S, 1] f32, energies [B, S, 1] f32).
    query/keys/values/wq/wu are streamed in `stream_dtype` (bf16 by default —
    pass bf16 arrays to make the wrapper cast a no-op); all accumulation, tanh
    and softmax run in f32.
    """
    B, Q = query.shape
    _, S, K = keys.shape
    V = values.shape[-1]
    Bn = wq.shape[-1]

    vmem_cap = _vmem_capacity_bytes()
    its = jnp.dtype(stream_dtype).itemsize
    if block_b is None:
        TB = _choose_block_b(B, S, its, vmem_cap)
    else:
        TB = max(_ALIGN, _round_up(block_b, _ALIGN))
    Bp = _round_up(B, TB)

    # Streamed operands: cast to the streaming dtype and flatten keys/values so
    # the kernel gets 2-D MXU-ready tiles (no in-kernel reshape of sub-32-bit
    # data -> no hidden relayout).
    q_s = query.astype(stream_dtype)
    k_s = keys.reshape(B * S, K).astype(stream_dtype)
    v_s = values.reshape(B * S, V).astype(stream_dtype)
    wq_s = wq.astype(stream_dtype)
    wu_s = wu.astype(stream_dtype)
    b2 = b.astype(jnp.float32).reshape(1, Bn)
    ww2 = ww.astype(jnp.float32).reshape(1, Bn)

    if Bp != B:
        pad = Bp - B
        q_s = jnp.pad(q_s, ((0, pad), (0, 0)))
        k_s = jnp.pad(k_s, ((0, pad * S), (0, 0)))
        v_s = jnp.pad(v_s, ((0, pad * S), (0, 0)))

    grid = (Bp // TB,)

    out_shapes = (
        jax.ShapeDtypeStruct((Bp, V), jnp.float32),   # attn
        jax.ShapeDtypeStruct((Bp, S), jnp.float32),   # weights
        jax.ShapeDtypeStruct((Bp, S), jnp.float32),   # energies
    )

    # Raise the scoped-VMEM limit generation-aware (stays well under physical).
    vmem_limit = int(min(vmem_cap, 128 << 20) * 0.7)

    attn, weights, energies = pl.pallas_call(
        semantic_attention_kernel,
        out_shape=out_shapes,
        grid_spec=pltpu.PrefetchScalarGridSpec(
            num_scalar_prefetch=0,
            grid=grid,
            in_specs=[
                pl.BlockSpec((TB, Q), lambda i: (i, 0)),        # query tile
                pl.BlockSpec((TB * S, K), lambda i: (i, 0)),    # keys tile (flattened)
                pl.BlockSpec((TB * S, V), lambda i: (i, 0)),    # values tile (flattened)
                pl.BlockSpec((Q, Bn), lambda i: (0, 0)),        # Wq (VMEM-resident)
                pl.BlockSpec((K, Bn), lambda i: (0, 0)),        # Wu (VMEM-resident)
                pl.BlockSpec((1, Bn), lambda i: (0, 0)),        # b
                pl.BlockSpec((1, Bn), lambda i: (0, 0)),        # w (scorer row)
            ],
            out_specs=(
                pl.BlockSpec((TB, V), lambda i: (i, 0)),
                pl.BlockSpec((TB, S), lambda i: (i, 0)),
                pl.BlockSpec((TB, S), lambda i: (i, 0)),
            ),
        ),
        compiler_params=pltpu.CompilerParams(
            dimension_semantics=("parallel",),   # batch tiles shard across v7x TCs
            vmem_limit_bytes=vmem_limit,
        ),
    )(q_s, k_s, v_s, wq_s, wu_s, b2, ww2)

    attn = attn[:B]
    weights = weights[:B, :, None]      # back to the PyTorch [B, S, 1] layout
    energies = energies[:B, :, None]
    return attn, weights, energies


def semantic_attention_ref(query, keys, values, wq, wu, b, ww):
    Wh = query @ wq                                       # [B, Bn]
    Uv = jnp.einsum('bsk,kn->bsn', keys, wu)              # [B, S, Bn]
    e = jnp.einsum('bsn,n->bs', jnp.tanh(Wh[:, None, :] + Uv + b), ww)[..., None]
    w = jax.nn.softmax(e, axis=1)
    attn = (values * w).sum(axis=1)
    return attn, w, e


if __name__ == "__main__":
    B, S = 2, 8
    Q = K = V = 32          # query_size, key_size, value feature dim
    Bn = 32                 # bottleneck_size

    key = jax.random.PRNGKey(0)
    k1, k2, k3, k4, k5, k6 = jax.random.split(key, 6)

    query = jax.random.normal(k1, (B, Q), dtype=jnp.float32)
    keys = jax.random.normal(k2, (B, S, K), dtype=jnp.float32)
    values = jax.random.normal(k3, (B, S, V), dtype=jnp.float32)

    # Parameters (deterministic init; b = ones like the PyTorch module).
    wq = 0.1 * jax.random.normal(k4, (Q, Bn), dtype=jnp.float32)   # W.weight.T
    wu = 0.1 * jax.random.normal(k5, (K, Bn), dtype=jnp.float32)   # U.weight.T
    ww = 0.1 * jax.random.normal(k6, (Bn,), dtype=jnp.float32)     # w.weight[0]
    b = jnp.ones((Bn,), dtype=jnp.float32)

    # --- default path: bf16-streamed inputs, f32 accumulation ----------------
    attn, weights, energies = jax.block_until_ready(
        semantic_attention(query, keys, values, wq, wu, b, ww))

    assert attn.shape == (B, V)
    assert weights.shape == (B, S, 1)
    assert energies.shape == (B, S, 1)

    # Reference on identically bf16-rounded operands (isolates kernel math).
    rd = lambda x: x.astype(jnp.bfloat16).astype(jnp.float32)
    attn_r, weights_r, energies_r = semantic_attention_ref(
        rd(query), rd(keys), rd(values), rd(wq), rd(wu), b, ww)

    assert jnp.allclose(attn, attn_r, atol=2e-4, rtol=1e-3)
    assert jnp.allclose(weights, weights_r, atol=2e-4, rtol=1e-3)
    assert jnp.allclose(energies, energies_r, atol=2e-4, rtol=1e-3)

    # --- f32-streamed path: strict check against the f32 reference -----------
    attn32, weights32, energies32 = jax.block_until_ready(
        semantic_attention(query, keys, values, wq, wu, b, ww,
                           stream_dtype=jnp.float32))
    attn_r32, weights_r32, energies_r32 = semantic_attention_ref(
        query, keys, values, wq, wu, b, ww)

    assert jnp.allclose(attn32, attn_r32, atol=1e-5, rtol=1e-5)
    assert jnp.allclose(weights32, weights_r32, atol=1e-5, rtol=1e-5)
    assert jnp.allclose(energies32, energies_r32, atol=1e-5, rtol=1e-5)

    print("KERNEL_OK")
</pallas_src>

<mosaic_0001>
module attributes {stable_mosaic.version = 11 : i64} {
  func.func @semantic_attention_kernel(%arg0: i32, %arg1: memref<16x32xbf16, #tpu.memory_space<vmem>>, %arg2: memref<128x32xbf16, #tpu.memory_space<vmem>>, %arg3: memref<128x32xbf16, #tpu.memory_space<vmem>>, %arg4: memref<32x32xbf16, #tpu.memory_space<vmem>>, %arg5: memref<32x32xbf16, #tpu.memory_space<vmem>>, %arg6: memref<1x32xf32, #tpu.memory_space<vmem>>, %arg7: memref<1x32xf32, #tpu.memory_space<vmem>>, %arg8: memref<16x32xf32, #tpu.memory_space<vmem>>, %arg9: memref<16x8xf32, #tpu.memory_space<vmem>>, %arg10: memref<16x8xf32, #tpu.memory_space<vmem>>) attributes {dimension_semantics = [#tpu.dimension_semantics<parallel>], iteration_bounds = array<i64: 1>, scalar_prefetch = 0 : i64, scratch_operands = 0 : i64, tpu.core_type = #tpu.core_type<tc>, window_params = [{transform_indices = @transform_0, window_bounds = array<i64: 16, 32>}, {transform_indices = @transform_1, window_bounds = array<i64: 128, 32>}, {transform_indices = @transform_2, window_bounds = array<i64: 128, 32>}, {pipeline_mode = #tpu.pipeline_mode<synchronous>, transform_indices = @transform_3, window_bounds = array<i64: 32, 32>}, {pipeline_mode = #tpu.pipeline_mode<synchronous>, transform_indices = @transform_4, window_bounds = array<i64: 32, 32>}, {pipeline_mode = #tpu.pipeline_mode<synchronous>, transform_indices = @transform_5, window_bounds = array<i64: 1, 32>}, {pipeline_mode = #tpu.pipeline_mode<synchronous>, transform_indices = @transform_6, window_bounds = array<i64: 1, 32>}, {transform_indices = @transform_7, window_bounds = array<i64: 16, 32>}, {transform_indices = @transform_8, window_bounds = array<i64: 16, 8>}, {transform_indices = @transform_9, window_bounds = array<i64: 16, 8>}]} {
    %c0 = arith.constant 0 : index
    %c0_0 = arith.constant 0 : index
    %0 = vector.load %arg1[%c0, %c0_0] : memref<16x32xbf16, #tpu.memory_space<vmem>>, vector<16x32xbf16>
    %c0_1 = arith.constant 0 : index
    %c0_2 = arith.constant 0 : index
    %1 = vector.load %arg2[%c0_1, %c0_2] : memref<128x32xbf16, #tpu.memory_space<vmem>>, vector<128x32xbf16>
    %c0_3 = arith.constant 0 : index
    %c0_4 = arith.constant 0 : index
    %2 = vector.load %arg3[%c0_3, %c0_4] : memref<128x32xbf16, #tpu.memory_space<vmem>>, vector<128x32xbf16>
    %c0_5 = arith.constant 0 : index
    %c0_6 = arith.constant 0 : index
    %3 = vector.load %arg4[%c0_5, %c0_6] : memref<32x32xbf16, #tpu.memory_space<vmem>>, vector<32x32xbf16>
    %cst = arith.constant dense<0.000000e+00> : vector<16x32xf32>
    %4 = tpu.matmul %0, %3, %cst {dimension_numbers = #tpu.dot_dimension_numbers<[1], [0], [0], [1], [0, 0, 1, 1], [], []>} : vector<16x32xbf16>, vector<32x32xbf16>, vector<16x32xf32> -> vector<16x32xf32>
    %c0_7 = arith.constant 0 : index
    %c0_8 = arith.constant 0 : index
    %5 = vector.load %arg6[%c0_7, %c0_8] : memref<1x32xf32, #tpu.memory_space<vmem>>, vector<1x32xf32>
    %6 = vector.broadcast %5 : vector<1x32xf32> to vector<16x32xf32>
    %7 = arith.addf %4, %6 : vector<16x32xf32>
    %c0_9 = arith.constant 0 : index
    %c0_10 = arith.constant 0 : index
    %8 = vector.load %arg5[%c0_9, %c0_10] : memref<32x32xbf16, #tpu.memory_space<vmem>>, vector<32x32xbf16>
    %cst_11 = arith.constant dense<0.000000e+00> : vector<128x32xf32>
    %9 = tpu.matmul %1, %8, %cst_11 {dimension_numbers = #tpu.dot_dimension_numbers<[1], [0], [0], [1], [0, 0, 1, 1], [], []>} : vector<128x32xbf16>, vector<32x32xbf16>, vector<128x32xf32> -> vector<128x32xf32>
    %10 = vector.shape_cast %9 : vector<128x32xf32> to vector<16x8x32xf32>
    %11 = vector.shape_cast %7 : vector<16x32xf32> to vector<16x1x32xf32>
    %12 = vector.broadcast %11 : vector<16x1x32xf32> to vector<16x8x32xf32>
    %13 = arith.addf %12, %10 : vector<16x8x32xf32>
    %14 = math.tanh %13 : vector<16x8x32xf32>
    %c0_12 = arith.constant 0 : index
    %c0_13 = arith.constant 0 : index
    %15 = vector.load %arg7[%c0_12, %c0_13] : memref<1x32xf32, #tpu.memory_space<vmem>>, vector<1x32xf32>
    %16 = vector.shape_cast %15 : vector<1x32xf32> to vector<1x1x32xf32>
    %17 = vector.broadcast %16 : vector<1x1x32xf32> to vector<16x8x32xf32>
    %18 = arith.mulf %14, %17 : vector<16x8x32xf32>
    %cst_14 = arith.constant dense<0.000000e+00> : vector<16x8xf32>
    %19 = vector.multi_reduction <add>, %18, %cst_14 [2] : vector<16x8x32xf32> to vector<16x8xf32>
    %cst_15 = arith.constant dense<0xFF800000> : vector<16xf32>
    %20 = vector.multi_reduction <maximumf>, %19, %cst_15 [1] : vector<16x8xf32> to vector<16xf32>
    %21 = vector.shape_cast %20 : vector<16xf32> to vector<16x1xf32>
    %22 = vector.broadcast %21 : vector<16x1xf32> to vector<16x8xf32>
    %23 = arith.subf %19, %22 : vector<16x8xf32>
    %24 = math.exp %23 : vector<16x8xf32>
    %cst_16 = arith.constant dense<0.000000e+00> : vector<16xf32>
    %25 = vector.multi_reduction <add>, %24, %cst_16 [1] : vector<16x8xf32> to vector<16xf32>
    %26 = vector.shape_cast %25 : vector<16xf32> to vector<16x1xf32>
    %27 = vector.broadcast %26 : vector<16x1xf32> to vector<16x8xf32>
    %28 = arith.divf %24, %27 : vector<16x8xf32>
    %c0_17 = arith.constant 0 : index
    %c0_18 = arith.constant 0 : index
    %29 = vector.load %arg10[%c0_17, %c0_18] : memref<16x8xf32, #tpu.memory_space<vmem>>, vector<16x8xf32>
    tpu.vector_store %arg10[%c0_17, %c0_18], %19 {strides = array<i32>} : memref<16x8xf32, #tpu.memory_space<vmem>>, vector<16x8xf32>,
    %c0_19 = arith.constant 0 : index
    %c0_20 = arith.constant 0 : index
    %30 = vector.load %arg9[%c0_19, %c0_20] : memref<16x8xf32, #tpu.memory_space<vmem>>, vector<16x8xf32>
    tpu.vector_store %arg9[%c0_19, %c0_20], %28 {strides = array<i32>} : memref<16x8xf32, #tpu.memory_space<vmem>>, vector<16x8xf32>,
    %31 = arith.extf %2 : vector<128x32xbf16> to vector<128x32xf32>
    %32 = vector.shape_cast %31 : vector<128x32xf32> to vector<16x8x32xf32>
    %33 = vector.shape_cast %28 : vector<16x8xf32> to vector<16x8x1xf32>
    %34 = vector.broadcast %33 : vector<16x8x1xf32> to vector<16x8x32xf32>
    %35 = arith.mulf %32, %34 : vector<16x8x32xf32>
    %cst_21 = arith.constant dense<0.000000e+00> : vector<16x32xf32>
    %36 = vector.multi_reduction <add>, %35, %cst_21 [1] : vector<16x8x32xf32> to vector<16x32xf32>
    %c0_22 = arith.constant 0 : index
    %c0_23 = arith.constant 0 : index
    %37 = vector.load %arg8[%c0_22, %c0_23] : memref<16x32xf32, #tpu.memory_space<vmem>>, vector<16x32xf32>
    tpu.vector_store %arg8[%c0_22, %c0_23], %36 {strides = array<i32>} : memref<16x32xf32, #tpu.memory_space<vmem>>, vector<16x32xf32>,
    return
  }
  func.func @transform_0(%arg0: i32) -> (i32, i32) {
    %c0_i32 = arith.constant 0 : i32
    %c0_i32_0 = arith.constant 0 : i32
    return %arg0, %c0_i32 : i32, i32
  }
  func.func @transform_1(%arg0: i32) -> (i32, i32) {
    %c0_i32 = arith.constant 0 : i32
    %c0_i32_0 = arith.constant 0 : i32
    return %arg0, %c0_i32 : i32, i32
  }
  func.func @transform_2(%arg0: i32) -> (i32, i32) {
    %c0_i32 = arith.constant 0 : i32
    %c0_i32_0 = arith.constant 0 : i32
    return %arg0, %c0_i32 : i32, i32
  }
  func.func @transform_3(%arg0: i32) -> (i32, i32) {
    %c0_i32 = arith.constant 0 : i32
    %c0_i32_0 = arith.constant 0 : i32
    %c0_i32_1 = arith.constant 0 : i32
    return %c0_i32, %c0_i32_0 : i32, i32
  }
  func.func @transform_4(%arg0: i32) -> (i32, i32) {
    %c0_i32 = arith.constant 0 : i32
    %c0_i32_0 = arith.constant 0 : i32
    %c0_i32_1 = arith.constant 0 : i32
    return %c0_i32, %c0_i32_0 : i32, i32
  }
  func.func @transform_5(%arg0: i32) -> (i32, i32) {
    %c0_i32 = arith.constant 0 : i32
    %c0_i32_0 = arith.constant 0 : i32
    %c0_i32_1 = arith.constant 0 : i32
    return %c0_i32, %c0_i32_0 : i32, i32
  }
  func.func @transform_6(%arg0: i32) -> (i32, i32) {
    %c0_i32 = arith.constant 0 : i32
    %c0_i32_0 = arith.constant 0 : i32
    %c0_i32_1 = arith.constant 0 : i32
    return %c0_i32, %c0_i32_0 : i32, i32
  }
  func.func @transform_7(%arg0: i32) -> (i32, i32) {
    %c0_i32 = arith.constant 0 : i32
    %c0_i32_0 = arith.constant 0 : i32
    return %arg0, %c0_i32 : i32, i32
  }
  func.func @transform_8(%arg0: i32) -> (i32, i32) {
    %c0_i32 = arith.constant 0 : i32
    %c0_i32_0 = arith.constant 0 : i32
    return %arg0, %c0_i32 : i32, i32
  }
  func.func @transform_9(%arg0: i32) -> (i32, i32) {
    %c0_i32 = arith.constant 0 : i32
    %c0_i32_0 = arith.constant 0 : i32
    return %arg0, %c0_i32 : i32, i32
  }
}

</mosaic_0001>

<bundles_post_ra>
// kernel: tpu_custom_call.1
= control target key start
LH: loop header
LB: loop body
LE: loop exit
PB: predicated region body
PF: predicated region fallthrough
CT: control target
= control target key end

     0   :  { %v1720_v1 = vmov 0.0   ;;  %vm1721_vm0 = vmmov 0   ;;  %vm93_vm1 = vcmask 261120   ;;  %s2347_s0 = inlined_call_operand.vmem [shape: bf16[16,32], index: 0, kind: input, shape index: {}]   ;;  %s2348_s1 = inlined_call_operand.vmem [shape: bf16[128,32], index: 1, kind: input, shape index: {}]   ;;  %s2349_s2 = inlined_call_operand.vmem [shape: bf16[128,32], index: 2, kind: input, shape index: {}]   ;;  %s2350_s3 = inlined_call_operand.vmem [shape: bf16[32,32], index: 3, kind: input, shape index: {}]   ;;  %s2351_s4 = inlined_call_operand.vmem [shape: bf16[32,32], index: 4, kind: input, shape index: {}]   ;;  %s2352_s5 = inlined_call_operand.vmem [shape: f32[1,32], index: 5, kind: input, shape index: {}]   ;;  %s2353_s6 = inlined_call_operand.vmem [shape: f32[1,32], index: 6, kind: input, shape index: {}]   ;;  %s2354_s7 = inlined_call_operand.hbm [shape: f32[16,32], index: 7, kind: output, shape index: {0}]   ;;  %s2355_s8 = inlined_call_operand.vmem [shape: f32[16,8], index: 8, kind: output, shape index: {1}]   ;;  %s2356_s9 = inlined_call_operand.vmem [shape: f32[16,8], index: 9, kind: output, shape index: {2}]  }
   0x1   :  { %v1587_v0 = vld [vmem:[%s2350_s3] sm:$0xff]   ;;  %1546 = vmatprep.subr.bf16.mxu0 %v1720_v1  ;;  %v1589_v3 = vld [vmem:[%s2350_s3 + $0x8] sm:$0xff]   ;;  %1550 = vmatprep.mubr.msk.bf16.mxu0 %vm1721_vm0, %v1720_v1  ;;  %v1592_v6 = vld [vmem:[%s2348_s1 + $0x10] sm:$0xff]  }
   0x2   :  { %v1588_v2 = vld [vmem:[%s2351_s4] sm:$0xff]   ;;  %1547 = vmatpush3.bf16.msra.mxu0 %v1587_v0  ;;  %v1590_v4 = vld [vmem:[%s2351_s4 + $0x8] sm:$0xff]   ;;  %v1593_v7 = vld [vmem:[%s2348_s1 + $0x18] sm:$0xff]   ;;  %1562 = vmatprep.mubr.msk.bf16.mxu1 %vm93_vm1, %v1592_v6 }
   0x3   :  { %1574 = vmatprep.subr.bf16.mxu1 %v1588_v2  ;;  %1548 = vmatprep.subr.bf16.mxu0 %v1720_v1  ;;  %v1591_v5 = vld [vmem:[%s2347_s0] sm:$0xff]   ;;  %v1595_v10 = vld [vmem:[%s2348_s1 + $0x8] sm:$0xff]  }
   0x4   :  { %1576 = vmatpush3.bf16.msra.mxu1 %v1588_v2  ;;  %v1594_v8 = vld [vmem:[%s2348_s1] sm:$0xff]  }
   0x5   :  { %1575 = vmatprep.subr.bf16.mxu1 %v1590_v4  ;;  %v1596_v9 = vld [vmem:[%s2348_s1 + $0x20] sm:$0xff]  }
   0x6   :  { %1549 = vmatpush3.bf16.msra.mxu0 %v1589_v3 }
   0x7   :  { %1554 = vmatprep.subr.bf16.mxu0 %v1588_v2 }
   0x8   :  { %1577 = vmatpush3.bf16.msra.mxu1 %v1590_v4 }
   0x9   :  { %1551 = vmatmul.mubr.msk.bf16.vlgmr.msra.gmra.mrb[0].mxu0 %vm93_vm1, %v1591_v5 }
   0xa   :  { %1555 = vmatpush3.bf16.msra.mxu0 %v1588_v2  ;;  %1558 = vmatprep.mubr.msk.bf16.mxu0 %vm93_vm1, %v1594_v8 }
   0xb   :  { %1563 = vmatmul.mubr.msk.bf16.vlgmr.msra.gmra.mrb[0].mxu1 %vm93_vm1, %v1593_v7  ;;  %1556 = vmatprep.subr.bf16.mxu0 %v1590_v4 }
   0xc   :  { %1566 = vmatprep.mubr.msk.bf16.mxu1 %vm93_vm1, %v1596_v9 }
   0xd   :  { %15 = vsyncpa [#allocation3], 0  ;;  %v1597_v11 = vld [vmem:[%s2348_s1 + $0x28] sm:$0xff]   ;;  %v1598_v12 = vld [vmem:[%s2348_s1 + $0x30] sm:$0xff]   ;;  %v1722_v14 = vmov 1966171168   ;;  %v321_v16 = vlaneseq }
   0xe   :  { %1557 = vmatpush3.bf16.msra.mxu0 %v1590_v4  ;;  %v1599_v13 = vld [vmem:[%s2348_s1 + $0x38] sm:$0xff]   ;;  %v319_v15 = vunpack.c.l.s4 %v1722_v14  ;;  %v1470_v19 = vld [vmem:[%s2352_s5] ss:$0 sm:$0xff]  ;;  %vm680_vm2 = vcmask 1041409   ;;  %vm682_vm3 = vcmask 1042434   ;;  %vm684_vm4 = vcmask 1043459  }
   0xf   :  { %v1826_v18 = vshrl.u32 %v321_v16, 7  ;;  %vm686_vm5 = vcmask 1044484   ;;  %vm688_vm6 = vcmask 1045509   ;;  %vm690_vm7 = vcmask 1046534  }
  0x10   :  { %v320_v17 = vunpack.c.0.s8 %v319_v15  ;;  %vm692_vm8 = vcmask 1047559   ;;  %vm703_vm9 = vcmask 64512  }
  0x11   :  { %1559 = vmatmul.mubr.msk.bf16.vlgmr.msra.gmra.mrb[4].mxu0 %vm93_vm1, %v1595_v10  ;;  %v1836_v31 = vsub.s32 0, %v1826_v18 }
  0x12   :  { %v1832_v20 = vsub.s32 %v320_v17, %v1826_v18 }
  0x13   :  { %1567 = vmatmul.mubr.msk.bf16.gmra.mrb[4].mxu1 %vm93_vm1, %v1597_v11 }
  0x14   :  { %1570 = vmatprep.mubr.msk.bf16.mxu1 %vm93_vm1, %v1598_v12 }
  0x1b   :  { %1571 = vmatmul.mubr.msk.bf16.gmra.mrb[8].mxu1 %vm93_vm1, %v1599_v13 }
  0xdc   :  { %v131_v21 = vpop.f32.mrb[0].mxu0 }
  0xdd   :  { %v132_v22 = vadd.f32 %v1470_v19, %v131_v21  ;;  %v1552_v23 = vpop.f32.mrb[1].mxu0 }
  0xde   :  { %v134_v24 = vpop.f32.mrb[2].mxu0  ;;  %v1564_v25 = vpop.f32.mrb[0].mxu1 }
  0xdf   :  { %v317_v26 = vcombine.high %v132_v22, %v132_v22  ;;  %v324_v27 = vrot.slane %v132_v22, %v1832_v20  ;;  %v135_v28 = vadd.f32 %v1470_v19, %v134_v24  ;;  %v1553_v29 = vpop.f32.mrb[3].mxu0  ;;  %v268_v30 = vpop.f32.mrb[1].mxu1 }
  0xe0   :  { %v1565_v32 = vpop.f32.mrb[2].mxu1 }
  0xe1   :  { %v331_v33 = vrot.slane %v317_v26, %v1832_v20  ;;  %v332_v34 = vcombine.high %v324_v27, %v324_v27  ;;  %v340_v35 = vrot.slane %v324_v27, %v1832_v20  ;;  %v366_v36 = vcombine.high %v135_v28, %v135_v28  ;;  %v271_v37 = vpop.f32.mrb[3].mxu1 }
  0xe2   :  { %v373_v38 = vrot.slane %v135_v28, %v1832_v20 }
  0xe3   :  { %v333_v39 = vcombine.high %v331_v33, %v331_v33  ;;  %v380_v40 = vrot.slane %v366_v36, %v1832_v20  ;;  %v347_v41 = vrot.slane %v331_v33, %v1832_v20  ;;  %v362_v42 = vcombine.high %v340_v35, %v340_v35  ;;  %v1868_v36 = vld [vmem:[%s2353_s6] ss:$0 sm:$0xff] }
  0xe4   :  { %v381_v43 = vcombine.high %v373_v38, %v373_v38  ;;  %v389_v44 = vrot.slane %v373_v38, %v1832_v20  ;;  %v1560_v45 = vpop.f32.mrb[4].mxu0  ;;  %v418_v46 = vrot.slane %v340_v35, %v1836_v31  ;;  %v354_v47 = vrot.slane %v332_v34, %v1832_v20 }
  0xe5   :  { %v382_v48 = vcombine.high %v380_v40, %v380_v40  ;;  %v363_v49 = vcombine.high %v347_v41, %v347_v41  ;;  %v434_v50 = vrot.slane %v347_v41, %v1836_v31  ;;  %v361_v51 = vrot.slane %v333_v39, %v1832_v20  ;;  %v252_v52 = vpop.f32.mrb[5].mxu0 }
  0xe6   :  { %v426_v53 = vrot.slane %v362_v42, %v1836_v31  ;;  %v495_v54 = vadd.f32 %v418_v46, %v252_v52  ;;  %v1568_v55 = vpop.f32.mrb[4].mxu1  ;;  %v411_v56 = vcombine.high %v389_v44, %v389_v44  ;;  %v1561_v57 = vpop.f32.mrb[6].mxu0  ;;  %v364_v58 = vcombine.high %v354_v47, %v354_v47 }
  0xe7   :  { %v442_v59 = vrot.slane %v363_v49, %v1836_v31  ;;  %v499_v60 = vadd.f32 %v434_v50, %v268_v30  ;;  %v365_v61 = vcombine.high %v361_v51, %v361_v51  ;;  %v438_v62 = vrot.slane %v361_v51, %v1836_v31  ;;  %v284_v63 = vpop.f32.mrb[5].mxu1  ;;  %v255_v0 = vpop.f32.mrb[7].mxu0 }
  0xe8   :  { %v497_v1 = vadd.f32 %v1560_v45, %v426_v53  ;;  %1600 = vtanh.f32 %v495_v54  ;;  %v458_v2 = vrot.slane %v411_v56, %v1836_v31  ;;  %v430_v3 = vrot.slane %v364_v58, %v1836_v31  ;;  %v1569_v4 = vpop.f32.mrb[6].mxu1 }
  0xe9   :  { %v501_v5 = vadd.f32 %v1564_v25, %v442_v59  ;;  %v446_v6 = vrot.slane %v365_v61, %v1836_v31  ;;  %v500_v7 = vadd.f32 %v438_v62, %v271_v37  ;;  %v287_v8 = vpop.f32.mrb[7].mxu1  ;;  %v450_v11 = vrot.slane %v389_v44, %v1836_v31 }
  0xea   :  { %1602 = vtanh.f32 %v497_v1  ;;  %v505_v9 = vadd.f32 %v1568_v55, %v458_v2  ;;  %v498_v10 = vadd.f32 %v1561_v57, %v430_v3  ;;  %v422_v13 = vrot.slane %v354_v47, %v1836_v31 }
  0xeb   :  { %v502_v12 = vadd.f32 %v1565_v32, %v446_v6  ;;  %v403_v14 = vrot.slane %v381_v43, %v1832_v20  ;;  %1604 = vtanh.f32 %v499_v60  ;;  %v503_v15 = vadd.f32 %v450_v11, %v284_v63 }
  0xec   :  { %v396_v17 = vrot.slane %v380_v40, %v1832_v20  ;;  %v410_v19 = vrot.slane %v382_v48, %v1832_v20  ;;  %v496_v21 = vadd.f32 %v422_v13, %v255_v0 }
  0xed   :  { %v413_v22 = vcombine.high %v403_v14, %v403_v14  ;;  %v454_v23 = vrot.slane %v403_v14, %v1836_v31  ;;  %1606 = vtanh.f32 %v503_v15 }
  0xee   :  { %v1572_v24 = vpop.f32.mrb[8].mxu1  ;;  %v412_v25 = vcombine.high %v396_v17, %v396_v17  ;;  %v466_v26 = vrot.slane %v396_v17, %v1836_v31  ;;  %v414_v27 = vcombine.high %v410_v19, %v410_v19  ;;  %v470_v32 = vrot.slane %v410_v19, %v1836_v31 }
  0xef   :  { %v462_v28 = vrot.slane %v413_v22, %v1836_v31  ;;  %v504_v29 = vadd.f32 %v454_v23, %v287_v8  ;;  %v300_v30 = vpop.f32.mrb[9].mxu1  ;;  %1608 = vtanh.f32 %v496_v21 }
  0xf0   :  { %v474_v33 = vrot.slane %v412_v25, %v1836_v31  ;;  %v507_v34 = vadd.f32 %v466_v26, %v300_v30  ;;  %v1573_v20 = vpop.f32.mrb[10].mxu1  ;;  %v478_v35 = vrot.slane %v414_v27, %v1836_v31 }
  0xf1   :  { %v506_v37 = vadd.f32 %v1569_v4, %v462_v28  ;;  %v303_v38 = vpop.f32.mrb[11].mxu1  ;;  %1610 = vtanh.f32 %v504_v29 }
  0xf2   :  { %v1601_v39 = vpop.eup %1600  ;;  %v509_v40 = vadd.f32 %v1572_v24, %v474_v33  ;;  %v510_v41 = vadd.f32 %v1573_v20, %v478_v35  ;;  %v508_v42 = vadd.f32 %v470_v32, %v303_v38  ;;  %1612 = vtanh.f32 %v505_v9 }
  0xf3   :  { %v534_v43 = vmul.f32 %v1601_v39, %v1868_v36  ;;  %1614 = vtanh.f32 %v498_v10 }
  0xf4   :  { %v1603_v44 = vpop.eup %1602  ;;  %1616 = vtanh.f32 %v500_v7 }
  0xf5   :  { %v550_v45 = vsel %vm93_vm1, %v534_v43, 0.0  ;;  %v536_v46 = vmul.f32 %v1603_v44, %v1868_v36  ;;  %v1605_v47 = vpop.eup %1604  ;;  %1618 = vtanh.f32 %v506_v37 }
  0xf6   :  { %551 = vadd.xlane.f32.xlu0 %v550_v45  ;;  %v538_v49 = vmul.f32 %v1605_v47, %v1868_v36  ;;  %1620 = vtanh.f32 %v501_v5 }
  0xf7   :  { %v556_v48 = vsel %vm93_vm1, %v536_v46, 0.0  ;;  %v1607_v50 = vpop.eup %1606  ;;  %1622 = vtanh.f32 %v509_v40 }
  0xf8   :  { %v542_v52 = vmul.f32 %v1607_v50, %v1868_v36  ;;  %v562_v57 = vsel %vm93_vm1, %v538_v49, 0.0  ;;  %1624 = vtanh.f32 %v502_v12 }
  0xf9   :  { %v1609_v51 = vpop.eup %1608  ;;  %1626 = vtanh.f32 %v507_v34  ;;  %v615_v34 = vand.u32 127, %v321_v16 }
  0xfa   :  { %557 = vadd.xlane.f32.xlu0 %v556_v48  ;;  %v574_v55 = vsel %vm93_vm1, %v542_v52, 0.0  ;;  %v535_v58 = vmul.f32 %v1609_v51, %v1868_v36  ;;  %1628 = vtanh.f32 %v508_v42 }
  0xfb   :  { %v1611_v53 = vpop.eup %1610  ;;  %575 = vadd.xlane.f32.xlu1 %v574_v55  ;;  %1630 = vtanh.f32 %v510_v41 }
  0xfc   :  { %v1613_v54 = vpop.eup %1612  ;;  %v543_v56 = vmul.f32 %v1611_v53, %v1868_v36  ;;  %v553_v63 = vsel %vm93_vm1, %v535_v58, 0.0 }
  0xfd   :  { %v1615_v59 = vpop.eup %1614  ;;  %v544_v62 = vmul.f32 %v1613_v54, %v1868_v36 }
  0xfe   :  { %563 = vadd.xlane.f32.xlu0 %v562_v57  ;;  %v1617_v60 = vpop.eup %1616  ;;  %v577_v61 = vsel %vm93_vm1, %v543_v56, 0.0  ;;  %v537_v0 = vmul.f32 %v1615_v59, %v1868_v36 }
  0xff   :  { %v1619_v1 = vpop.eup %1618  ;;  %578 = vadd.xlane.f32.xlu1 %v577_v61  ;;  %v580_v3 = vsel %vm93_vm1, %v544_v62, 0.0  ;;  %v539_v6 = vmul.f32 %v1617_v60, %v1868_v36 }
 0x100   :  { %v1621_v2 = vpop.eup %1620  ;;  %v545_v4 = vmul.f32 %v1619_v1, %v1868_v36  ;;  %v559_v5 = vsel %vm93_vm1, %v537_v0, 0.0 }
 0x101   :  { %v1623_v7 = vpop.eup %1622  ;;  %v565_v11 = vsel %vm93_vm1, %v539_v6, 0.0  ;;  %v540_v12 = vmul.f32 %v1621_v2, %v1868_v36 }
 0x102   :  { %554 = vadd.xlane.f32.xlu0 %v553_v63  ;;  %v1625_v8 = vpop.eup %1624  ;;  %v583_v9 = vsel %vm93_vm1, %v545_v4, 0.0  ;;  %v548_v10 = vmul.f32 %v1623_v7, %v1868_v36 }
 0x103   :  { %581 = vadd.xlane.f32.xlu1 %v580_v3  ;;  %v1627_v13 = vpop.eup %1626  ;;  %v568_v17 = vsel %vm93_vm1, %v540_v12, 0.0  ;;  %v541_v19 = vmul.f32 %v1625_v8, %v1868_v36 }
 0x104   :  { %v592_v14 = vsel %vm93_vm1, %v548_v10, 0.0  ;;  %v546_v15 = vmul.f32 %v1627_v13, %v1868_v36  ;;  %v1629_v21 = vpop.eup %1628 }
 0x105   :  { %v547_v23 = vmul.f32 %v1629_v21, %v1868_v36  ;;  %v571_v24 = vsel %vm93_vm1, %v541_v19, 0.0  ;;  %v1631_v25 = vpop.eup %1630  ;;  %v1995_v19 = vsub.s32 3, %v1826_v18 }
 0x106   :  { %560 = vadd.xlane.f32.xlu0 %v559_v5  ;;  %v586_v22 = vsel %vm93_vm1, %v546_v15, 0.0  ;;  %v549_v27 = vmul.f32 %v1631_v25, %v1868_v36  ;;  %v1916_v36 = vsub.s32 %v615_v34, %v1826_v18  ;;  %v1989_v15 = vsub.s32 1, %v1826_v18 }
 0x107   :  { %584 = vadd.xlane.f32.xlu1 %v583_v9  ;;  %v589_v26 = vsel %vm93_vm1, %v547_v23, 0.0  ;;  %v2006_v25 = vsub.s32 4, %v1826_v18 }
 0x108   :  { %v595_v28 = vsel %vm93_vm1, %v549_v27, 0.0 }
 0x10a   :  { %566 = vadd.xlane.f32.xlu0 %v565_v11 }
 0x10b   :  { %593 = vadd.xlane.f32.xlu1 %v592_v14  ;;  %v1723_v14 = vmov 0  }
 0x10c   :  { %1586 = vset.pattern.permute.xlu1 %v1723_v14  ;;  %1585 = vset.pattern.permute.xlu0 %v1723_v14 }
 0x10e   :  { %569 = vadd.xlane.f32.xlu0 %v568_v17  ;;  %v1992_v17 = vsub.s32 2, %v1826_v18 }
 0x10f   :  { %587 = vadd.xlane.f32.xlu1 %v586_v22 }
 0x112   :  { %572 = vadd.xlane.f32.xlu0 %v571_v24 }
 0x113   :  { %590 = vadd.xlane.f32.xlu1 %v589_v26 }
 0x117   :  { %596 = vadd.xlane.f32.xlu1 %v595_v28 }
 0x183   :  { %v1902_v29 = vpop.xlane.xlu0 %551 }
 0x184   :  { %v619_v40 = vrot.slane %v1902_v29, %v1916_v36 }
 0x187   :  { %v1904_v30 = vpop.xlane.xlu0 %557 }
 0x188   :  { %v1906_v32 = vpop.xlane.xlu1 %575  ;;  %v627_v44 = vrot.slane %v1904_v30, %v1916_v36 }
 0x189   :  { %v651_v57 = vrot.slane %v1906_v32, %v1916_v36 }
 0x18b   :  { %v1908_v33 = vpop.xlane.xlu0 %563 }
 0x18c   :  { %v1911_v20 = vpop.xlane.xlu1 %578  ;;  %v635_v50 = vrot.slane %v1908_v33, %v1916_v36 }
 0x18d   :  { %v655_v52 = vrot.slane %v1911_v20, %v1916_v36 }
 0x18f   :  { %v1913_v35 = vpop.xlane.xlu0 %554  ;;  %v694_v63 = vsel %vm680_vm2, %v655_v52, %v651_v57 }
 0x190   :  { %v1918_v37 = vpop.xlane.xlu1 %581  ;;  %v623_v39 = vrot.slane %v1913_v35, %v1916_v36 }
 0x191   :  { %v659_v53 = vrot.slane %v1918_v37, %v1916_v36 }
 0x192   :  { %v681_v42 = vsel %vm680_vm2, %v623_v39, %v619_v40 }
 0x193   :  { %v1920_v38 = vpop.xlane.xlu0 %560  ;;  %v683_v45 = vsel %vm682_vm3, %v627_v44, %v681_v42  ;;  %v695_v1 = vsel %vm682_vm3, %v659_v53, %v694_v63  ;;  %v2014_v42 = vsub.s32 5, %v1826_v18 }
 0x194   :  { %v1926_v41 = vpop.xlane.xlu1 %584  ;;  %v631_v43 = vrot.slane %v1920_v38, %v1916_v36 }
 0x195   :  { %v663_v58 = vrot.slane %v1926_v41, %v1916_v36 }
 0x196   :  { %v685_v48 = vsel %vm684_vm4, %v631_v43, %v683_v45 }
 0x197   :  { %v1928_v16 = vpop.xlane.xlu0 %566  ;;  %v687_v56 = vsel %vm686_vm5, %v635_v50, %v685_v48  ;;  %v696_v4 = vsel %vm684_vm4, %v663_v58, %v695_v1  ;;  %v2021_v48 = vsub.s32 6, %v1826_v18 }
 0x198   :  { %v1936_v46 = vpop.xlane.xlu1 %593  ;;  %v639_v49 = vrot.slane %v1928_v16, %v1916_v36 }
 0x199   :  { %v675_v8 = vrot.slane %v1936_v46, %v1916_v36 }
 0x19a   :  { %v689_v60 = vsel %vm688_vm6, %v639_v49, %v687_v56 }
 0x19b   :  { %v1938_v47 = vpop.xlane.xlu0 %569 }
 0x19c   :  { %v643_v51 = vrot.slane %v1938_v47, %v1916_v36  ;;  %v588_v54 = vpop.xlane.xlu1 %587 }
 0x19d   :  { %v667_v61 = vrot.slane %v588_v54, %v1916_v36 }
 0x19e   :  { %v691_v62 = vsel %vm690_vm7, %v643_v51, %v689_v60 }
 0x19f   :  { %v1951_v55 = vpop.xlane.xlu0 %572  ;;  %v697_v6 = vsel %vm686_vm5, %v667_v61, %v696_v4 }
 0x1a0   :  { %v647_v59 = vrot.slane %v1951_v55, %v1916_v36  ;;  %v591_v2 = vpop.xlane.xlu1 %590 }
 0x1a1   :  { %v671_v5 = vrot.slane %v591_v2, %v1916_v36 }
 0x1a2   :  { %v693_v0 = vsel %vm692_vm8, %v647_v59, %v691_v62 }
 0x1a3   :  { %v704_v3 = vsel %vm703_vm9, %v693_v0, -inf  ;;  %1104 = vst.msk [vmem:[%s2356_s9] sm:$0xff] %vm703_vm9, %v693_v0  ;;  %v698_v7 = vsel %vm688_vm6, %v671_v5, %v697_v6 }
 0x1a4   :  { %705 = vmax.xlane.f32.xlu0 %v704_v3  ;;  %v1977_v9 = vpop.xlane.xlu1 %596  ;;  %v699_v11 = vsel %vm690_vm7, %v675_v8, %v698_v7 }
 0x1a5   :  { %v679_v10 = vrot.slane %v1977_v9, %v1916_v36 }
 0x1a7   :  { %v700_v12 = vsel %vm692_vm8, %v679_v10, %v699_v11 }
 0x1a8   :  { %v707_v13 = vsel %vm703_vm9, %v700_v12, -inf  ;;  %1105 = vst.msk [vmem:[%s2356_s9 + $0x8] sm:$0xff] %vm703_vm9, %v700_v12 }
 0x1a9   :  { %708 = vmax.xlane.f32.xlu1 %v707_v13 }
 0x231   :  { %v1997_v21 = vpop.xlane.xlu0 %705 }
 0x232   :  { %v715_v22 = vrot.slane %v1997_v21, %v1836_v31  ;;  %v719_v23 = vrot.slane %v1997_v21, %v1989_v15  ;;  %v723_v24 = vrot.slane %v1997_v21, %v1992_v17  ;;  %v727_v28 = vrot.slane %v1997_v21, %v1995_v19 }
 0x233   :  { %v731_v43 = vrot.slane %v1997_v21, %v2006_v25  ;;  %v739_v53 = vrot.slane %v1997_v21, %v2021_v48 }
 0x234   :  { %v792_v26 = vsub.f32 %v1902_v29, %v715_v22  ;;  %v793_v27 = vsub.f32 %v1913_v35, %v719_v23  ;;  %v794_v34 = vsub.f32 %v1904_v30, %v723_v24  ;;  %v795_v44 = vsub.f32 %v1920_v38, %v727_v28 }
 0x235   :  { %v735_v30 = vrot.slane %v1997_v21, %v2014_v42  ;;  %v796_v49 = vsub.f32 %v1908_v33, %v731_v43  ;;  %v2028_v38 = vsub.s32 7, %v1826_v18  ;;  %v798_v18 = vsub.f32 %v1938_v47, %v739_v53 }
 0x236   :  { %v808_v39 = vmul.f32 1.442695, %v792_v26  ;;  %v810_v40 = vmul.f32 1.442695, %v793_v27  ;;  %v812_v29 = vmul.f32 1.442695, %v794_v34  ;;  %v709_v45 = vpop.xlane.xlu1 %708 }
 0x237   :  { %v763_v35 = vrot.slane %v709_v45, %v2006_v25  ;;  %v814_v50 = vmul.f32 1.442695, %v795_v44  ;;  %v767_v51 = vrot.slane %v709_v45, %v2014_v42  ;;  %v797_v56 = vsub.f32 %v1928_v16, %v735_v30 }
 0x238   :  { %1632 = vpow2.f32 %v808_v39  ;;  %v816_v57 = vmul.f32 1.442695, %v796_v49  ;;  %v771_v58 = vrot.slane %v709_v45, %v2021_v48  ;;  %v747_v62 = vrot.slane %v709_v45, %v1836_v31 }
 0x239   :  { %1634 = vpow2.f32 %v810_v40  ;;  %v804_v52 = vsub.f32 %v588_v54, %v763_v35  ;;  %v805_v59 = vsub.f32 %v591_v2, %v767_v51  ;;  %v818_v54 = vmul.f32 1.442695, %v797_v56 }
 0x23a   :  { %1636 = vpow2.f32 %v812_v29  ;;  %v775_v16 = vrot.slane %v709_v45, %v2028_v38  ;;  %v806_v63 = vsub.f32 %v1936_v46, %v771_v58  ;;  %v820_v2 = vmul.f32 1.442695, %v798_v18 }
 0x23b   :  { %1638 = vpow2.f32 %v814_v50  ;;  %v832_v60 = vmul.f32 1.442695, %v804_v52  ;;  %v834_v0 = vmul.f32 1.442695, %v805_v59  ;;  %v800_v3 = vsub.f32 %v1906_v32, %v747_v62 }
 0x23c   :  { %1640 = vpow2.f32 %v816_v57  ;;  %v751_v47 = vrot.slane %v709_v45, %v1989_v15  ;;  %v807_v4 = vsub.f32 %v1977_v9, %v775_v16  ;;  %v836_v5 = vmul.f32 1.442695, %v806_v63 }
 0x23d   :  { %1642 = vpow2.f32 %v832_v60  ;;  %v824_v46 = vmul.f32 1.442695, %v800_v3  ;;  %v755_v7 = vrot.slane %v709_v45, %v1992_v17  ;;  %v759_v9 = vrot.slane %v709_v45, %v1995_v19 }
 0x23e   :  { %1644 = vpow2.f32 %v818_v54  ;;  %v801_v8 = vsub.f32 %v1911_v20, %v751_v47  ;;  %v838_v32 = vmul.f32 1.442695, %v807_v4  ;;  %v743_v22 = vrot.slane %v1997_v21, %v2028_v38 }
 0x23f   :  { %1646 = vpow2.f32 %v834_v0  ;;  %v802_v12 = vsub.f32 %v1918_v37, %v755_v7  ;;  %v803_v23 = vsub.f32 %v1926_v41, %v759_v9 }
 0x240   :  { %1648 = vpow2.f32 %v820_v2  ;;  %v826_v13 = vmul.f32 1.442695, %v801_v8  ;;  %v799_v27 = vsub.f32 %v1951_v55, %v743_v22 }
 0x241   :  { %1650 = vpow2.f32 %v836_v5  ;;  %v828_v24 = vmul.f32 1.442695, %v802_v12  ;;  %v830_v28 = vmul.f32 1.442695, %v803_v23 }
 0x242   :  { %v2034_v33 = vpop.eup %1632  ;;  %1652 = vpow2.f32 %v824_v46  ;;  %v822_v41 = vmul.f32 1.442695, %v799_v27 }
 0x243   :  { %v2036_v61 = vpop.eup %1634  ;;  %857 = vperm.xlu0 %1585, %v2034_v33   ;;  %1654 = vpow2.f32 %v838_v32 }
 0x244   :  { %860 = vperm.xlu1 %1586, %v2036_v61   ;;  %v2044_v1 = vpop.eup %1636  ;;  %1656 = vpow2.f32 %v826_v13 }
 0x245   :  { %v2050_v6 = vpop.eup %1638  ;;  %1658 = vpow2.f32 %v828_v24 }
 0x246   :  { %v2055_v10 = vpop.eup %1640  ;;  %1660 = vpow2.f32 %v830_v28 }
 0x247   :  { %v2057_v11 = vpop.eup %1642  ;;  %1662 = vpow2.f32 %v822_v41 }
 0x248   :  { %863 = vperm.xlu1 %1586, %v2044_v1   ;;  %893 = vperm.xlu0 %1585, %v2057_v11   ;;  %v2063_v14 = vpop.eup %1644 }
 0x249   :  { %v2065_v20 = vpop.eup %1646 }
 0x24a   :  { %v2072_v26 = vpop.eup %1648 }
 0x24b   :  { %v2074_v37 = vpop.eup %1650 }
 0x24c   :  { %866 = vperm.xlu1 %1586, %v2050_v6   ;;  %896 = vperm.xlu0 %1585, %v2065_v20   ;;  %v2079_v34 = vpop.eup %1652 }
 0x24d   :  { %v2081_v39 = vpop.eup %1654 }
 0x24e   :  { %v2085_v21 = vpop.eup %1656 }
 0x24f   :  { %v2088_v40 = vpop.eup %1658 }
 0x250   :  { %869 = vperm.xlu1 %1586, %v2055_v10   ;;  %899 = vperm.xlu0 %1585, %v2074_v37   ;;  %v2091_v55 = vpop.eup %1660 }
 0x251   :  { %v2094_v43 = vpop.eup %1662 }
 0x254   :  { %872 = vperm.xlu1 %1586, %v2063_v14   ;;  %902 = vperm.xlu0 %1585, %v2081_v39  }
 0x258   :  { %875 = vperm.xlu1 %1586, %v2072_v26  }
 0x25c   :  { %881 = vperm.xlu1 %1586, %v2079_v34  }
 0x260   :  { %884 = vperm.xlu1 %1586, %v2085_v21  }
 0x264   :  { %887 = vperm.xlu1 %1586, %v2088_v40  }
 0x268   :  { %890 = vperm.xlu1 %1586, %v2091_v55  }
 0x26c   :  { %878 = vperm.xlu1 %1586, %v2094_v43  }
 0x2c2   :  { %v858_v30 = vpop.permute.xlu0 %857 }
 0x2c3   :  { %v861_v44 = vpop.permute.xlu1 %860  ;;  %v907_v60 = vrot.slane %v858_v30, %v1916_v36 }
 0x2c4   :  { %v911_v59 = vrot.slane %v861_v44, %v1916_v36 }
 0x2c6   :  { %v968_v3 = vsel %vm680_vm2, %v911_v59, %v907_v60 }
 0x2c7   :  { %v864_v29 = vpop.permute.xlu1 %863  ;;  %v894_v50 = vpop.permute.xlu0 %893 }
 0x2c8   :  { %v915_v54 = vrot.slane %v864_v29, %v1916_v36  ;;  %v955_v7 = vrot.slane %v894_v50, %v1916_v36 }
 0x2ca   :  { %v969_v46 = vsel %vm682_vm3, %v915_v54, %v968_v3 }
 0x2cb   :  { %v867_v45 = vpop.permute.xlu1 %866  ;;  %v897_v53 = vpop.permute.xlu0 %896 }
 0x2cc   :  { %v919_v16 = vrot.slane %v867_v45, %v1916_v36  ;;  %v959_v13 = vrot.slane %v897_v53, %v1916_v36 }
 0x2ce   :  { %v970_v12 = vsel %vm684_vm4, %v919_v16, %v969_v46 }
 0x2cf   :  { %v870_v35 = vpop.permute.xlu1 %869  ;;  %v900_v57 = vpop.permute.xlu0 %899 }
 0x2d0   :  { %v923_v0 = vrot.slane %v870_v35, %v1916_v36  ;;  %v963_v24 = vrot.slane %v900_v57, %v1916_v36 }
 0x2d2   :  { %v971_v23 = vsel %vm686_vm5, %v923_v0, %v970_v12 }
 0x2d3   :  { %v873_v49 = vpop.permute.xlu1 %872  ;;  %v903_v8 = vpop.permute.xlu0 %902 }
 0x2d4   :  { %v927_v47 = vrot.slane %v873_v49, %v1916_v36  ;;  %v967_v44 = vrot.slane %v903_v8, %v1916_v36 }
 0x2d6   :  { %v972_v41 = vsel %vm688_vm6, %v927_v47, %v971_v23 }
 0x2d7   :  { %v876_v51 = vpop.permute.xlu1 %875 }
 0x2d8   :  { %v931_v32 = vrot.slane %v876_v51, %v1916_v36 }
 0x2da   :  { %v973_v35 = vsel %vm690_vm7, %v931_v32, %v972_v41 }
 0x2db   :  { %v882_v52 = vpop.permute.xlu1 %881 }
 0x2dc   :  { %v939_v63 = vrot.slane %v882_v52, %v1916_v36 }
 0x2df   :  { %v885_v56 = vpop.permute.xlu1 %884 }
 0x2e0   :  { %v943_v18 = vrot.slane %v885_v56, %v1916_v36 }
 0x2e2   :  { %v975_v4 = vsel %vm680_vm2, %v943_v18, %v939_v63 }
 0x2e3   :  { %v888_v58 = vpop.permute.xlu1 %887 }
 0x2e4   :  { %v947_v62 = vrot.slane %v888_v58, %v1916_v36 }
 0x2e6   :  { %v976_v9 = vsel %vm682_vm3, %v947_v62, %v975_v4 }
 0x2e7   :  { %v891_v2 = vpop.permute.xlu1 %890 }
 0x2e8   :  { %v951_v5 = vrot.slane %v891_v2, %v1916_v36 }
 0x2ea   :  { %v977_v22 = vsel %vm684_vm4, %v951_v5, %v976_v9 }
 0x2eb   :  { %v978_v27 = vsel %vm686_vm5, %v955_v7, %v977_v22  ;;  %v879_v28 = vpop.permute.xlu1 %878 }
 0x2ec   :  { %v935_v29 = vrot.slane %v879_v28, %v1916_v36  ;;  %v979_v45 = vsel %vm688_vm6, %v959_v13, %v978_v27 }
 0x2ed   :  { %v980_v30 = vsel %vm690_vm7, %v963_v24, %v979_v45 }
 0x2ee   :  { %v974_v49 = vsel %vm692_vm8, %v935_v29, %v973_v35  ;;  %v981_v50 = vsel %vm692_vm8, %v967_v44, %v980_v30 }
 0x2ef   :  { %v984_v51 = vsel %vm703_vm9, %v974_v49, 0.0  ;;  %v987_v52 = vsel %vm703_vm9, %v981_v50, 0.0 }
 0x2f0   :  { %985 = vadd.xlane.f32.xlu1 %v984_v51  ;;  %988 = vadd.xlane.f32.xlu0 %v987_v52  ;;  %v2177_v52 = vld [vmem:[%s2349_s2 + $0x28] sm:$0xff]  }
 0x37d   :  { %v986_v53 = vpop.xlane.xlu1 %985  ;;  %v989_v56 = vpop.xlane.xlu0 %988 }
 0x37e   :  { %v999_v57 = vrot.slane %v986_v53, %v1989_v15  ;;  %v995_v58 = vrot.slane %v986_v53, %v1836_v31  ;;  %v1003_v59 = vrot.slane %v986_v53, %v1992_v17  ;;  %v1031_v60 = vrot.slane %v989_v56, %v1989_v15 }
 0x37f   :  { %v1007_v18 = vrot.slane %v986_v53, %v1995_v19  ;;  %v1035_v54 = vrot.slane %v989_v56, %v1992_v17  ;;  %v1011_v62 = vrot.slane %v986_v53, %v2006_v25  ;;  %v1039_v16 = vrot.slane %v989_v56, %v1995_v19 }
 0x380   :  { %1664 = vrcp.f32 %v999_v57  ;;  %v1015_v0 = vrot.slane %v986_v53, %v2014_v42  ;;  %v1043_v3 = vrot.slane %v989_v56, %v2006_v25  ;;  %v1027_v5 = vrot.slane %v989_v56, %v1836_v31 }
 0x381   :  { %1666 = vrcp.f32 %v995_v58  ;;  %v1047_v46 = vrot.slane %v989_v56, %v2014_v42  ;;  %v1019_v25 = vrot.slane %v986_v53, %v2021_v48  ;;  %v1051_v32 = vrot.slane %v989_v56, %v2021_v48  ;;  %v2185_v58 = vld [vmem:[%s2349_s2 + $0x10] sm:$0xff]  }
 0x382   :  { %1668 = vrcp.f32 %v1003_v59  ;;  %v1023_v42 = vrot.slane %v986_v53, %v2028_v38  ;;  %v1055_v12 = vrot.slane %v989_v56, %v2028_v38 }
 0x383   :  { %1670 = vrcp.f32 %v1031_v60 }
 0x384   :  { %1672 = vrcp.f32 %v1007_v18 }
 0x385   :  { %1674 = vrcp.f32 %v1035_v54 }
 0x386   :  { %1676 = vrcp.f32 %v1011_v62 }
 0x387   :  { %1678 = vrcp.f32 %v1039_v16 }
 0x388   :  { %1680 = vrcp.f32 %v1015_v0  ;;  %v2195_v0 = vld [vmem:[%s2349_s2 + $0x30] sm:$0xff]  }
 0x389   :  { %1682 = vrcp.f32 %v1043_v3  ;;  %v1504_v3 = vunpack.c.l.bf16 %v2185_v58 }
 0x38a   :  { %v1665_v63 = vpop.eup %1664  ;;  %1684 = vrcp.f32 %v1027_v5 }
 0x38b   :  { %v1667_v2 = vpop.eup %1666  ;;  %v1075_v15 = vmul.f32 %v1665_v63, %v2036_v61  ;;  %1686 = vrcp.f32 %v1047_v46  ;;  %v1516_v63 = vunpack.c.l.bf16 %v2177_v52  ;;  %v1505_v46 = vunpack.c.h.bf16 %v2185_v58 }
 0x38c   :  { %v1669_v47 = vpop.eup %1668  ;;  %v1073_v4 = vmul.f32 %v1667_v2, %v2034_v33  ;;  %1688 = vrcp.f32 %v1019_v25 }
 0x38d   :  { %v1671_v17 = vpop.eup %1670  ;;  %1126 = vperm.xlu1 %1586, %v1075_v15   ;;  %v1077_v19 = vmul.f32 %v1669_v47, %v2044_v1  ;;  %1690 = vrcp.f32 %v1051_v32  ;;  %v1517_v47 = vunpack.c.h.bf16 %v2177_v52 }
 0x38e   :  { %1123 = vperm.xlu0 %1585, %v1073_v4   ;;  %v1673_v7 = vpop.eup %1672  ;;  %v1091_v61 = vmul.f32 %v1671_v17, %v2085_v21  ;;  %1692 = vrcp.f32 %v1023_v42  ;;  %v2211_v42 = vld [vmem:[%s2349_s2 + $0x18] sm:$0xff]  }
 0x38f   :  { %v1675_v8 = vpop.eup %1674  ;;  %v1079_v33 = vmul.f32 %v1673_v7, %v2050_v6  ;;  %1694 = vrcp.f32 %v1055_v12 }
 0x390   :  { %v1677_v31 = vpop.eup %1676  ;;  %v1093_v1 = vmul.f32 %v1675_v8, %v2088_v40 }
 0x391   :  { %1129 = vperm.xlu1 %1586, %v1077_v19   ;;  %v1679_v9 = vpop.eup %1678  ;;  %v1081_v21 = vmul.f32 %v1677_v31, %v2055_v10 }
 0x392   :  { %1150 = vperm.xlu0 %1585, %v1091_v61   ;;  %v1681_v13 = vpop.eup %1680  ;;  %v1095_v6 = vmul.f32 %v1679_v9, %v2091_v55  ;;  %v1521_v9 = vunpack.c.h.bf16 %v2195_v0 }
 0x393   :  { %v1683_v22 = vpop.eup %1682  ;;  %v1083_v48 = vmul.f32 %v1681_v13, %v2063_v14 }
 0x394   :  { %v1685_v40 = vpop.eup %1684  ;;  %v1097_v23 = vmul.f32 %v1683_v22, %v2057_v11 }
 0x395   :  { %1132 = vperm.xlu1 %1586, %v1079_v33   ;;  %v1687_v24 = vpop.eup %1686  ;;  %v1089_v10 = vmul.f32 %v1685_v40, %v2079_v34  ;;  %v1520_v33 = vunpack.c.l.bf16 %v2195_v0 }
 0x396   :  { %1153 = vperm.xlu0 %1585, %v1093_v1   ;;  %v1689_v27 = vpop.eup %1688  ;;  %v1099_v38 = vmul.f32 %v1687_v24, %v2065_v20  ;;  %v1495_v20 = vld [vmem:[%s2349_s2] sm:$0xff]  }
 0x397   :  { %v1691_v28 = vpop.eup %1690  ;;  %v1085_v55 = vmul.f32 %v1689_v27, %v2072_v26  ;;  %v1497_v34 = vunpack.c.h.bf16 %v1495_v20  ;;  %v1496_v45 = vunpack.c.l.bf16 %v1495_v20  ;;  %v1526_v26 = vld [vmem:[%s2349_s2 + $0x8] sm:$0xff]  }
 0x398   :  { %v1693_v41 = vpop.eup %1692  ;;  %v1101_v14 = vmul.f32 %v1691_v28, %v2074_v37  ;;  %v2170_v37 = vld [vmem:[%s2349_s2 + $0x20] sm:$0xff]   ;;  %v1500_v30 = vunpack.c.l.bf16 %v1526_v26  ;;  %v1501_v54 = vunpack.c.h.bf16 %v1526_v26 }
 0x399   :  { %1135 = vperm.xlu1 %1586, %v1081_v21   ;;  %v1695_v44 = vpop.eup %1694  ;;  %v1087_v11 = vmul.f32 %v1693_v41, %v2094_v43  ;;  %v1513_v50 = vunpack.c.h.bf16 %v2170_v37  ;;  %v1512_v1 = vunpack.c.l.bf16 %v2170_v37  ;;  %v2216_v21 = vld [vmem:[%s2349_s2 + $0x38] sm:$0xff]  }
 0x39a   :  { %1156 = vperm.xlu0 %1585, %v1095_v6   ;;  %v1103_v29 = vmul.f32 %v1695_v44, %v2081_v39  ;;  %v1524_v41 = vunpack.c.l.bf16 %v2216_v21 }
 0x39d   :  { %1138 = vperm.xlu1 %1586, %v1083_v48  }
 0x39e   :  { %1159 = vperm.xlu0 %1585, %v1097_v23  }
 0x3a1   :  { %1147 = vperm.xlu1 %1586, %v1089_v10  }
 0x3a2   :  { %1162 = vperm.xlu0 %1585, %v1099_v38  }
 0x3a5   :  { %1141 = vperm.xlu1 %1586, %v1085_v55   ;;  %v1508_v55 = vunpack.c.l.bf16 %v2211_v42 }
 0x3a6   :  { %1165 = vperm.xlu0 %1585, %v1101_v14  }
 0x3a9   :  { %1144 = vperm.xlu1 %1586, %v1087_v11   ;;  %v1509_v11 = vunpack.c.h.bf16 %v2211_v42 }
 0x3aa   :  { %1168 = vperm.xlu0 %1585, %v1103_v29   ;;  %v1525_v29 = vunpack.c.h.bf16 %v2216_v21 }
 0x40c   :  { %v1127_v43 = vpop.permute.xlu1 %1126 }
 0x40d   :  { %v1285_v35 = vmul.f32 %v1497_v34, %v1127_v43  ;;  %v1124_v39 = vpop.permute.xlu0 %1123  ;;  %v1177_v12 = vrot.slane %v1127_v43, %v1916_v36 }
 0x40e   :  { %v1284_v49 = vmul.f32 %v1496_v45, %v1124_v39  ;;  %v1173_v13 = vrot.slane %v1124_v39, %v1916_v36 }
 0x40f   :  { %v1307_v51 = vsel %vm93_vm1, %v1285_v35, 0.0 }
 0x410   :  { %v1308_v53 = vrot.slane %v1307_v51, 4  ;;  %v1300_v56 = vsel %vm93_vm1, %v1284_v49, 0.0  ;;  %v2180_v57 = vpop.permute.xlu1 %1129  ;;  %v1234_v20 = vsel %vm680_vm2, %v1177_v12, %v1173_v13 }
 0x411   :  { %v1301_v59 = vrot.slane %v1300_v56, 4  ;;  %v1286_v60 = vmul.f32 %v1500_v30, %v2180_v57  ;;  %v2188_v18 = vpop.permute.xlu0 %1150  ;;  %v1181_v14 = vrot.slane %v2180_v57, %v1916_v36 }
 0x412   :  { %v1309_v62 = vadd.f32 %v1308_v53, %v1307_v51  ;;  %v1293_v16 = vmul.f32 %v1513_v50, %v2188_v18  ;;  %v1209_v51 = vrot.slane %v2188_v18, %v1916_v36 }
 0x413   :  { %v1302_v2 = vadd.f32 %v1301_v59, %v1300_v56  ;;  %v1314_v15 = vsel %vm93_vm1, %v1286_v60, 0.0  ;;  %v1235_v57 = vsel %vm682_vm3, %v1181_v14, %v1234_v20 }
 0x414   :  { %v1310_v4 = vrot.slane %v1309_v62, 2  ;;  %v1315_v17 = vrot.slane %v1314_v15, 4  ;;  %v1363_v5 = vsel %vm93_vm1, %v1293_v16, 0.0  ;;  %v1133_v19 = vpop.permute.xlu1 %1132 }
 0x415   :  { %v1303_v7 = vrot.slane %v1302_v2, 2  ;;  %v1364_v61 = vrot.slane %v1363_v5, 4  ;;  %v1287_v8 = vmul.f32 %v1501_v54, %v1133_v19  ;;  %v2202_v25 = vpop.permute.xlu0 %1153  ;;  %v1185_v45 = vrot.slane %v1133_v19, %v1916_v36 }
 0x416   :  { %v1316_v32 = vadd.f32 %v1315_v17, %v1314_v15  ;;  %v1294_v31 = vmul.f32 %v1516_v63, %v2202_v25  ;;  %v1311_v48 = vadd.f32 %v1310_v4, %v1309_v62  ;;  %v1213_v58 = vrot.slane %v2202_v25, %v1916_v36 }
 0x417   :  { %v1365_v6 = vadd.f32 %v1364_v61, %v1363_v5  ;;  %v1321_v22 = vsel %vm93_vm1, %v1287_v8, 0.0  ;;  %v1304_v40 = vadd.f32 %v1303_v7, %v1302_v2  ;;  %v1236_v62 = vsel %vm684_vm4, %v1185_v45, %v1235_v57 }
 0x418   :  { %v1322_v23 = vrot.slane %v1321_v22, 4  ;;  %v1370_v24 = vsel %vm93_vm1, %v1294_v31, 0.0  ;;  %v1136_v10 = vpop.permute.xlu1 %1135  ;;  %v1317_v27 = vrot.slane %v1316_v32, 2  ;;  %v1312_v43 = vrot.slane %v1311_v48, 1 }
 0x419   :  { %v1371_v38 = vrot.slane %v1370_v24, 4  ;;  %v2222_v28 = vpop.permute.xlu0 %1156  ;;  %v1288_v44 = vmul.f32 %v1504_v3, %v1136_v10  ;;  %v1366_v34 = vrot.slane %v1365_v6, 2  ;;  %v1305_v35 = vrot.slane %v1304_v40, 1 }
 0x41a   :  { %v1323_v39 = vadd.f32 %v1322_v23, %v1321_v22  ;;  %v2233_v50 = vadd.f32 %v1317_v27, %v1316_v32  ;;  %v1189_v52 = vrot.slane %v1136_v10, %v1916_v36  ;;  %v1295_v60 = vmul.f32 %v1517_v47, %v2222_v28 }
 0x41b   :  { %v1372_v26 = vadd.f32 %v1371_v38, %v1370_v24  ;;  %v1328_v30 = vsel %vm93_vm1, %v1288_v44, 0.0  ;;  %v1367_v54 = vadd.f32 %v1366_v34, %v1365_v6  ;;  %v2245_v2 = vadd.f32 %v1312_v43, %v1311_v48 }
 0x41c   :  { %v1139_v49 = vpop.permute.xlu1 %1138  ;;  %v1329_v53 = vrot.slane %v1328_v30, 4  ;;  %v2247_v18 = vadd.f32 %v1305_v35, %v1304_v40  ;;  %v1324_v15 = vrot.slane %v1323_v39, 2  ;;  %v1377_v3 = vsel %vm93_vm1, %v1295_v60, 0.0 }
 0x41d   :  { %v2238_v56 = vpop.permute.xlu0 %1159  ;;  %v1373_v59 = vrot.slane %v1372_v26, 2  ;;  %v1289_v63 = vmul.f32 %v1505_v46, %v1139_v49  ;;  %v1319_v17 = vrot.slane %v2233_v50, 1  ;;  %v1237_v5 = vsel %vm686_vm5, %v1189_v52, %v1236_v62 }
 0x41e   :  { %v1330_v16 = vadd.f32 %v1329_v53, %v1328_v30  ;;  %v1378_v19 = vrot.slane %v1377_v3, 4  ;;  %v1217_v61 = vrot.slane %v2222_v28, %v1916_v36  ;;  %v1296_v8 = vmul.f32 %v1520_v33, %v2238_v56 }
 0x41f   :  { %v1335_v47 = vsel %vm93_vm1, %v1289_v63, 0.0  ;;  %v1374_v7 = vadd.f32 %v1373_v59, %v1372_v26  ;;  %v1368_v32 = vrot.slane %v1367_v54, 1  ;;  %v2257_v6 = vadd.f32 %v1324_v15, %v1323_v39 }
 0x420   :  { %v1148_v4 = vpop.permute.xlu1 %1147  ;;  %v1336_v46 = vrot.slane %v1335_v47, 4  ;;  %v1331_v31 = vrot.slane %v1330_v16, 2  ;;  %v1379_v12 = vadd.f32 %v1378_v19, %v1377_v3  ;;  %v1384_v48 = vsel %vm93_vm1, %v1296_v8, 0.0 }
 0x421   :  { %v1163_v25 = vpop.permute.xlu0 %1162  ;;  %v1205_v13 = vrot.slane %v1148_v4, %v1916_v36  ;;  %v1292_v40 = vmul.f32 %v1512_v1, %v1148_v4  ;;  %v1193_v10 = vrot.slane %v1139_v49, %v1916_v36  ;;  %v1385_v27 = vrot.slane %v1384_v48, 4 }
 0x422   :  { %v1337_v22 = vadd.f32 %v1336_v46, %v1335_v47  ;;  %v1380_v24 = vrot.slane %v1379_v12, 2  ;;  %v1375_v38 = vrot.slane %v1374_v7, 1  ;;  %v2266_v20 = vadd.f32 %v1331_v31, %v1330_v16 }
 0x423   :  { %v1241_v33 = vsel %vm680_vm2, %v1209_v51, %v1205_v13  ;;  %v1356_v44 = vsel %vm93_vm1, %v1292_v40, 0.0  ;;  %v1386_v45 = vadd.f32 %v1385_v27, %v1384_v48  ;;  %v1369_v37 = vadd.f32 %v1368_v32, %v1367_v54 }
 0x424   :  { %v1142_v23 = vpop.permute.xlu1 %1141  ;;  %v1338_v28 = vrot.slane %v1337_v22, 2  ;;  %v1242_v14 = vsel %vm682_vm3, %v1213_v58, %v1241_v33  ;;  %v1381_v34 = vadd.f32 %v1380_v24, %v1379_v12  ;;  %v1357_v26 = vrot.slane %v1356_v44, 4 }
 0x425   :  { %v1326_v1 = vrot.slane %v2257_v6, 1  ;;  %v1297_v35 = vmul.f32 %v1521_v9, %v1163_v25  ;;  %v1166_v39 = vpop.permute.xlu0 %1165  ;;  %v1238_v30 = vsel %vm688_vm6, %v1193_v10, %v1237_v5  ;;  %v1243_v51 = vsel %vm684_vm4, %v1217_v61, %v1242_v14 }
 0x426   :  { %v2269_v43 = vadd.f32 %v1338_v28, %v1337_v22  ;;  %v1358_v49 = vadd.f32 %v1357_v26, %v1356_v44  ;;  %v1197_v52 = vrot.slane %v1142_v23, %v1916_v36  ;;  %v1376_v53 = vadd.f32 %v1375_v38, %v1374_v7 }
 0x427   :  { %v1221_v57 = vrot.slane %v2238_v56, %v1916_v36  ;;  %v1387_v58 = vrot.slane %v1386_v45, 2  ;;  %v1391_v59 = vsel %vm93_vm1, %v1297_v35, 0.0  ;;  %v1333_v54 = vrot.slane %v2266_v20, 1 }
 0x428   :  { %v1145_v60 = vpop.permute.xlu1 %1144  ;;  %v1382_v0 = vrot.slane %v1381_v34, 1  ;;  %v1359_v9 = vrot.slane %v1358_v49, 2  ;;  %v1225_v62 = vrot.slane %v1163_v25, %v1916_v36  ;;  %v1340_v16 = vrot.slane %v2269_v43, 1 }
 0x429   :  { %v1244_v63 = vsel %vm686_vm5, %v1221_v57, %v1243_v51  ;;  %v1392_v15 = vrot.slane %v1391_v59, 4  ;;  %v1290_v3 = vmul.f32 %v1508_v55, %v1142_v23  ;;  %v1239_v56 = vsel %vm690_vm7, %v1197_v52, %v1238_v30  ;;  %v1169_v8 = vpop.permute.xlu0 %1168 }
 0x42a   :  { %v1360_v4 = vadd.f32 %v1359_v9, %v1358_v49  ;;  %v1298_v5 = vmul.f32 %v1524_v41, %v1166_v39  ;;  %v1201_v19 = vrot.slane %v1145_v60, %v1916_v36  ;;  %v1388_v47 = vadd.f32 %v1387_v58, %v1386_v45 }
 0x42b   :  { %v1393_v7 = vadd.f32 %v1392_v15, %v1391_v59  ;;  %v1342_v61 = vsel %vm93_vm1, %v1290_v3, 0.0  ;;  %v1229_v46 = vrot.slane %v1166_v39, %v1916_v36  ;;  %v1245_v32 = vsel %vm688_vm6, %v1225_v62, %v1244_v63 }
 0x42c   :  { %v1361_v25 = vrot.slane %v1360_v4, 1  ;;  %v1343_v31 = vrot.slane %v1342_v61, 4  ;;  %v1398_v55 = vsel %vm93_vm1, %v1298_v5, 0.0  ;;  %v1240_v22 = vsel %vm692_vm8, %v1201_v19, %v1239_v56 }
 0x42d   :  { %v1394_v12 = vrot.slane %v1393_v7, 2  ;;  %v1399_v13 = vrot.slane %v1398_v55, 4  ;;  %v1291_v41 = vmul.f32 %v1509_v11, %v1145_v60  ;;  %1250 = vst.msk [vmem:[%s2355_s8] sm:$0xff] %vm703_vm9, %v1240_v22  ;;  %v1233_v23 = vrot.slane %v1169_v8, %v1916_v36 }
 0x42e   :  { %v1362_v48 = vadd.f32 %v1361_v25, %v1360_v4  ;;  %v1344_v40 = vadd.f32 %v1343_v31, %v1342_v61  ;;  %v1299_v24 = vmul.f32 %v1525_v29, %v1169_v8  ;;  %v1246_v27 = vsel %vm690_vm7, %v1229_v46, %v1245_v32 }
 0x42f   :  { %v1395_v10 = vadd.f32 %v1394_v12, %v1393_v7  ;;  %v1400_v33 = vadd.f32 %v1399_v13, %v1398_v55  ;;  %v1349_v38 = vsel %vm93_vm1, %v1291_v41, 0.0  ;;  %v1247_v14 = vsel %vm692_vm8, %v1233_v23, %v1246_v27 }
 0x430   :  { %v1435_v42 = vsel %vm680_vm2, %v1369_v37, %v1362_v48  ;;  %v1345_v11 = vrot.slane %v1344_v40, 2  ;;  %v1350_v28 = vrot.slane %v1349_v38, 4  ;;  %v1389_v44 = vrot.slane %v1388_v47, 1  ;;  %1251 = vst.msk [vmem:[%s2355_s8 + $0x8] sm:$0xff] %vm703_vm9, %v1247_v14  ;;  %s1724_s8 = smov [#allocation2]  }
 0x431   :  { %v1436_v45 = vsel %vm682_vm3, %v1376_v53, %v1435_v42  ;;  %v1401_v26 = vrot.slane %v1400_v33, 2  ;;  %v1405_v36 = vsel %vm93_vm1, %v1299_v24, 0.0  ;;  %v1383_v21 = vadd.f32 %v1382_v0, %v1381_v34  ;;  %s1451_s10 = sshll.u32 %s1724_s8, 4  ;;  %s1452_s10 = int_to_ptr.vmem [resolvable:$true] %s1451_s10 }
 0x432   :  { %v1346_v29 = vadd.f32 %v1345_v11, %v1344_v40  ;;  %v1351_v35 = vadd.f32 %v1350_v28, %v1349_v38  ;;  %v1406_v39 = vrot.slane %v1405_v36, 4  ;;  %v1320_v37 = vadd.f32 %v1319_v17, %v2233_v50  ;;  %s1696_s11 = scalar_lea.vmem %s1452_s10, 256  ;;  %p1701_p1 = scmp.lt.s32.totalorder %s1452_s10, %s1452_s10 }
 0x433   :  { %v1327_v30 = vadd.f32 %v1326_v1, %v2257_v6  ;;  %v1396_v49 = vrot.slane %v1395_v10, 1  ;;  %v1402_v51 = vadd.f32 %v1401_v26, %v1400_v33  ;;  %v1437_v52 = vsel %vm684_vm4, %v1383_v21, %v1436_v45  ;;  %p1697_p0 = scmp.ne.s32.totalorder %s1452_s10, %s1696_s11  ;;  %p1702_p2 = scmp.lt.s32.totalorder %s1696_s11, %s1696_s11 }
 0x434   :  { %v1347_v53 = vrot.slane %v1346_v29, 1  ;;  %v1352_v57 = vrot.slane %v1351_v35, 2  ;;  %v1407_v58 = vadd.f32 %v1406_v39, %v1405_v36  ;;  %v1334_v59 = vadd.f32 %v1333_v54, %v2266_v20 }
 0x435   :  { %v1390_v60 = vadd.f32 %v1389_v44, %v1388_v47  ;;  %v1403_v34 = vrot.slane %v1402_v51, 1  ;;  %v1428_v0 = vsel %vm680_vm2, %v2245_v2, %v2247_v18  ;;  %v1341_v9 = vadd.f32 %v1340_v16, %v2269_v43  ;;  %p1703_p3 = por %p1702_p2, %p1701_p1 }
 0x436   :  { %v1353_v50 = vadd.f32 %v1352_v57, %v1351_v35  ;;  %v1408_v17 = vrot.slane %v1407_v58, 2  ;;  %v1429_v6 = vsel %vm682_vm3, %v1320_v37, %v1428_v0  ;;  %v1348_v62 = vadd.f32 %v1347_v53, %v1346_v29 }
 0x437   :  { %v1438_v1 = vsel %vm686_vm5, %v1390_v60, %v1437_v52  ;;  %v1430_v63 = vsel %vm684_vm4, %v1327_v30, %v1429_v6  ;;  %v1397_v15 = vadd.f32 %v1396_v49, %v1395_v10  ;;  %v1404_v4 = vadd.f32 %v1403_v34, %v1402_v51  ;;  %p1704_p4 = pnand %p1703_p3, %p1697_p0 }
 0x438   :  { %v1354_v3 = vrot.slane %v1353_v50, 1  ;;  %v1409_v20 = vadd.f32 %v1408_v17, %v1407_v58  ;;  %v1431_v54 = vsel %vm686_vm5, %v1334_v59, %v1430_v63 }
 0x439   :  { %v1432_v56 = vsel %vm688_vm6, %v1341_v9, %v1431_v54  ;;  %v1439_v2 = vsel %vm688_vm6, %v1397_v15, %v1438_v1 }
 0x43a   :  { %v1355_v18 = vadd.f32 %v1354_v3, %v1353_v50  ;;  %v1410_v43 = vrot.slane %v1409_v20, 1  ;;  %v1433_v16 = vsel %vm690_vm7, %v1348_v62, %v1432_v56  ;;  %v1440_v47 = vsel %vm690_vm7, %v1404_v4, %v1439_v2 }
 0x43c   :  { %v1411_v5 = vadd.f32 %v1410_v43, %v1409_v20  ;;  %v1434_v19 = vsel %vm692_vm8, %v1355_v18, %v1433_v16 }
 0x43d   :  { %1444 = vst.msk [vmem:[#allocation2] sm:$0xff] %vm93_vm1, %v1434_v19 }
 0x43e   :  { %v1441_v7 = vsel %vm692_vm8, %v1411_v5, %v1440_v47 }
 0x43f   :  { %1445 = vst.msk [vmem:[#allocation2 + $0x8] sm:$0xff] %vm93_vm1, %v1441_v7 }
 0x440   :  { %1707 = shalt.err (!%p1704_p4)
}
 0x441   :  { %s1708_s5 = scalar_lea.hbm %s2354_s7, 256 }
 0x442   :  { %p1709_p5 = scmp.ne.s32.totalorder %s2354_s7, %s1708_s5  ;;  %p1712_p6 = scmp.lt.u32.totalorder %s1708_s5, %s2354_s7 }
 0x444   :  { %p1714_p7 = pnand %p1712_p6, %p1709_p5 }
 0x446   :  { %1717 = shalt.err (!%p1714_p7)
}
 0x447   :  { %s1725_s9 = smov 128   ;;  %s1726_s16 = smov 8  }
 0x448   :  { %1457 = dma.vmem_to_hbm [thread:$0]  %s1452_s10, 256, %s2354_s7, [#allocation3], %s1725_s9, %s1725_s9, %s1726_s16  }
 0x449   :  { %1718 = dma.done.wait [#allocation3], 256  }
 0x44a   :  { %1719 = vsyncadd [#allocation3], 4294967040 }
 0x44b   :  { %1469 = vsyncpa [#allocation3], 1 }

</bundles_post_ra>
